<compile_context>
chip_gen: v5e
topology: v5e:2x2
jax: 0.10.0
libtpu: 0.0.40
codegen_flags: <defaults>
</compile_context>

<pallas_src>
import jax
import jax.numpy as jnp
from jax.experimental import pallas as pl
from jax.experimental.pallas import tpu as pltpu

_MIB = 1024 * 1024


def _avgpool_kernel(real_ref, imag_ref, out_ref):
    # real_ref / imag_ref: (TILE_ROWS, HW) f32 tiles in VMEM.
    # out_ref: (TILE_ROWS, 2) f32 — lane 0 = real mean, lane 1 = imag mean.
    inv_hw = jnp.float32(1.0 / real_ref.shape[-1])
    mean_r = jnp.sum(real_ref[...], axis=-1, keepdims=True) * inv_hw
    mean_i = jnp.sum(imag_ref[...], axis=-1, keepdims=True) * inv_hw
    out_ref[...] = jnp.concatenate([mean_r, mean_i], axis=-1)


def _vmem_budgets():
    """Returns (input_budget_bytes, vmem_limit_bytes), generation-aware.

    v5e / v6e have 128 MiB physical VMEM -> be generous.
    v7x has only 64 MiB per TensorCore (and is also the fallback when the
    hardware query is unavailable) -> stay conservative.
    """
    try:
        cap = pltpu.get_tpu_info().vmem_capacity_bytes
    except Exception:
        cap = None
    if cap is not None and cap >= 100 * _MIB:  # v5e / v6e (128 MiB physical)
        return 48 * _MIB, 96 * _MIB
    return 24 * _MIB, 48 * _MIB               # v7x (64 MiB per TC) / unknown


def _pick_tile_rows(nc, hw, budget_bytes, min_grid_steps=4):
    """Largest row tile (multiple of 8) whose double-buffered input footprint
    fits the budget, using the lane-padded width:
        bytes = 2 buffers * 2 planes * tile_rows * (ceil(HW/128)*128) * 4
    and additionally capped so the grid keeps >= min_grid_steps steps when NC
    permits (so the 'parallel' row axis can shard across both v7x cores)."""
    padded_hw = ((hw + 127) // 128) * 128
    max_rows_budget = budget_bytes // (2 * 2 * padded_hw * 4)
    max_rows_budget = max(8, (max_rows_budget // 8) * 8)

    nc_padded = ((nc + 7) // 8) * 8

    rows_for_steps = -(-nc_padded // min_grid_steps)          # ceil
    rows_for_steps = max(8, ((rows_for_steps + 7) // 8) * 8)  # round up to 8

    return int(min(max_rows_budget, nc_padded, rows_for_steps))


def pseudo_complex_avg_pool2d(x, *, tile_rows=None):
    """x: complex64 array of shape (N, C, H, W). Returns complex64 (N, C, 1, 1)."""
    N, C, H, W = x.shape
    NC, HW = N * C, H * W

    budget_bytes, vmem_limit_bytes = _vmem_budgets()
    if tile_rows is None:
        tile_rows = _pick_tile_rows(NC, HW, budget_bytes)

    # Wrapper-side split (see TODO above); fusible into the input DMA.
    real = jnp.real(x).astype(jnp.float32).reshape(NC, HW)
    imag = jnp.imag(x).astype(jnp.float32).reshape(NC, HW)

    grid = (pl.cdiv(NC, tile_rows),)

    cost = pl.CostEstimate(
        flops=2 * NC * (HW + 1),
        transcendentals=0,
        bytes_accessed=2 * NC * HW * 4 + NC * 2 * 4,
    )

    out = pl.pallas_call(
        _avgpool_kernel,
        out_shape=jax.ShapeDtypeStruct((NC, 2), jnp.float32),
        grid=grid,
        in_specs=[
            pl.BlockSpec((tile_rows, HW), lambda i: (i, 0)),
            pl.BlockSpec((tile_rows, HW), lambda i: (i, 0)),
        ],
        out_specs=pl.BlockSpec((tile_rows, 2), lambda i: (i, 0)),
        compiler_params=pltpu.CompilerParams(
            dimension_semantics=("parallel",),   # rows independent -> 2-TC shard on v7x
            vmem_limit_bytes=vmem_limit_bytes,
            allow_input_fusion=[True, True],     # fuse real/imag split into input DMA
        ),
        cost_estimate=cost,
    )(real, imag)

    real_out = out[:, 0].reshape(N, C, 1, 1)
    imag_out = out[:, 1].reshape(N, C, 1, 1)
    return jax.lax.complex(real_out, imag_out)


if __name__ == "__main__":
    key = jax.random.PRNGKey(0)
    kr, ki = jax.random.split(key)
    N, C, H, W = 2, 4, 16, 16
    x_real = jax.random.normal(kr, (N, C, H, W), dtype=jnp.float32)
    x_imag = jax.random.normal(ki, (N, C, H, W), dtype=jnp.float32)
    x = jax.lax.complex(x_real, x_imag)  # complex64, NCHW

    pool = jax.jit(pseudo_complex_avg_pool2d)
    out = pool(x)
    out = jax.block_until_ready(out)

    # Reference check in plain JAX (mirrors AdaptiveAvgPool2d((1,1))).
    ref = jax.lax.complex(
        jnp.mean(x_real, axis=(2, 3), keepdims=True),
        jnp.mean(x_imag, axis=(2, 3), keepdims=True),
    )
    assert out.shape == (N, C, 1, 1)
    assert out.dtype == jnp.complex64
    assert jnp.allclose(out, ref, atol=1e-6, rtol=1e-6)

    print("KERNEL_OK")
</pallas_src>

<mosaic_0001>
module attributes {stable_mosaic.version = 11 : i64} {
  func.func @_avgpool_kernel(%arg0: i32, %arg1: memref<8x256xf32, #tpu.memory_space<vmem>>, %arg2: memref<8x256xf32, #tpu.memory_space<vmem>>, %arg3: memref<8x2xf32, #tpu.memory_space<vmem>>) attributes {dimension_semantics = [#tpu.dimension_semantics<parallel>], iteration_bounds = array<i64: 1>, scalar_prefetch = 0 : i64, scratch_operands = 0 : i64, tpu.core_type = #tpu.core_type<tc>, window_params = [{transform_indices = @transform_0, window_bounds = array<i64: 8, 256>}, {transform_indices = @transform_1, window_bounds = array<i64: 8, 256>}, {transform_indices = @transform_2, window_bounds = array<i64: 8, 2>}]} {
    %c0 = arith.constant 0 : index
    %c0_0 = arith.constant 0 : index
    %0 = vector.load %arg1[%c0, %c0_0] : memref<8x256xf32, #tpu.memory_space<vmem>>, vector<8x256xf32>
    %cst = arith.constant dense<0.000000e+00> : vector<8xf32>
    %1 = vector.multi_reduction <add>, %0, %cst [1] : vector<8x256xf32> to vector<8xf32>
    %2 = vector.shape_cast %1 : vector<8xf32> to vector<8x1xf32>
    %cst_1 = arith.constant 3.906250e-03 : f32
    %3 = vector.broadcast %cst_1 : f32 to vector<8x1xf32>
    %4 = arith.mulf %2, %3 : vector<8x1xf32>
    %c0_2 = arith.constant 0 : index
    %c0_3 = arith.constant 0 : index
    %5 = vector.load %arg2[%c0_2, %c0_3] : memref<8x256xf32, #tpu.memory_space<vmem>>, vector<8x256xf32>
    %cst_4 = arith.constant dense<0.000000e+00> : vector<8xf32>
    %6 = vector.multi_reduction <add>, %5, %cst_4 [1] : vector<8x256xf32> to vector<8xf32>
    %7 = vector.shape_cast %6 : vector<8xf32> to vector<8x1xf32>
    %cst_5 = arith.constant 3.906250e-03 : f32
    %8 = vector.broadcast %cst_5 : f32 to vector<8x1xf32>
    %9 = arith.mulf %7, %8 : vector<8x1xf32>
    %10 = tpu.concatenate %4, %9 in 1 : vector<8x1xf32>, vector<8x1xf32> -> vector<8x2xf32>
    %c0_6 = arith.constant 0 : index
    %c0_7 = arith.constant 0 : index
    %11 = vector.load %arg3[%c0_6, %c0_7] : memref<8x2xf32, #tpu.memory_space<vmem>>, vector<8x2xf32>
    tpu.vector_store %arg3[%c0_6, %c0_7], %10 {strides = array<i32>} : memref<8x2xf32, #tpu.memory_space<vmem>>, vector<8x2xf32>,
    return
  }
  func.func @transform_0(%arg0: i32) -> (i32, i32) {
    %c0_i32 = arith.constant 0 : i32
    %c0_i32_0 = arith.constant 0 : i32
    return %arg0, %c0_i32 : i32, i32
  }
  func.func @transform_1(%arg0: i32) -> (i32, i32) {
    %c0_i32 = arith.constant 0 : i32
    %c0_i32_0 = arith.constant 0 : i32
    return %arg0, %c0_i32 : i32, i32
  }
  func.func @transform_2(%arg0: i32) -> (i32, i32) {
    %c0_i32 = arith.constant 0 : i32
    %c0_i32_0 = arith.constant 0 : i32
    return %arg0, %c0_i32 : i32, i32
  }
}

</mosaic_0001>

<bundles_post_ra>
// kernel: custom-call.1
= control target key start
LH: loop header
LB: loop body
LE: loop exit
PB: predicated region body
PF: predicated region fallthrough
CT: control target
= control target key end

     0   :  { %s56_s0 = inlined_call_operand.hbm [shape: c64[2,4,16,16], index: 0, kind: input, shape index: {}]   ;;  %s57_s1 = inlined_call_operand.vmem [shape: f32[2,4,16,16], index: 1, kind: output, shape index: {}]  }
   0x1   :  { %s2_s8 = scalar_lea.hbm %s56_s0, 128 }
   0x2   :  { %3 = vsyncpa [#allocation0], 0  ;;  %s5_s9 = sshll.u32 %s2_s8, 4  ;;  %s7_s12 = sshll.u32 %s57_s1, 4  ;;  %s6_s9 = int_to_ptr.hbm [resolvable:$true] %s5_s9  ;;  %s8_s12 = int_to_ptr.vmem [resolvable:$true] %s7_s12 }
   0x3   :  { %10 = dma.hbm_to_vmem [thread:$0]  %s6_s9, 2048, %s8_s12, [#allocation0] }
   0x4   :  { %38 = dma.done.wait [#allocation0], 2048  }
   0x5   :  { %39 = vsyncadd [#allocation0], 4294965248 }
   0x6   :  { %13 = vsyncpa [#allocation0], 1 }

// kernel: custom-call
= control target key start
LH: loop header
LB: loop body
LE: loop exit
PB: predicated region body
PF: predicated region fallthrough
CT: control target
= control target key end

     0   :  { %2 = vsyncpa [#allocation0], 0  ;;  %s55_s0 = inlined_call_operand.hbm [shape: c64[2,4,16,16], index: 0, kind: input, shape index: {}]   ;;  %s56_s1 = inlined_call_operand.vmem [shape: f32[2,4,16,16], index: 1, kind: output, shape index: {}]  }
   0x1   :  { %s4_s8 = sshll.u32 %s55_s0, 4  ;;  %s6_s11 = sshll.u32 %s56_s1, 4  ;;  %s5_s8 = int_to_ptr.hbm [resolvable:$true] %s4_s8  ;;  %s7_s11 = int_to_ptr.vmem [resolvable:$true] %s6_s11 }
   0x2   :  { %9 = dma.hbm_to_vmem [thread:$0]  %s5_s8, 2048, %s7_s11, [#allocation0] }
   0x3   :  { %37 = dma.done.wait [#allocation0], 2048  }
   0x4   :  { %38 = vsyncadd [#allocation0], 4294965248 }
   0x5   :  { %12 = vsyncpa [#allocation0], 1 }

// kernel: squeeze.3
= control target key start
LH: loop header
LB: loop body
LE: loop exit
PB: predicated region body
PF: predicated region fallthrough
CT: control target
= control target key end

     0   :  { %vm7_vm0 = vcmask 31744   ;;  %s39_s0 = inlined_call_operand.vmem [shape: f32[8], index: 0, kind: input, shape index: {}]   ;;  %s40_s1 = inlined_call_operand.vmem [shape: f32[2,4,1,1], index: 1, kind: output, shape index: {}]  }
   0x1   :  { %v4_v0 = vld [vmem:[%s39_s0] sm:$0x1]  ;;  %s22_s0 = smov 124  }
   0x2   :  { %5 = vst [vmem:[#allocation1] sm:$0x1] %v4_v0 }
   0x9   :  { %v9_v1 = vld [vmem:[#allocation1] sm:$0x1]  }
   0xa   :  { %v6_v2 = vld [vmem:[#allocation1] sm:$0x1]   ;;  %10 = vrot.lane.b32.xlu0 %v9_v1, %s22_s0 }
   0xb   :  { %8 = vst.msk [vmem:[#allocation0] sm:$0x1] %vm7_vm0, %v6_v2  }
  0x7c   :  { %v11_v3 = vpop.permute.xlu0 %10  }
  0x7d   :  { %14 = vst.msk [vmem:[#allocation0 + $0x1] sm:$0x1] %vm7_vm0, %v11_v3  }
  0x84   :  { %v17_v4 = vld [vmem:[#allocation0] sm:$0x3] }
  0x85   :  { %20 = vst [vmem:[%s40_s1] sm:$0x3] %v17_v4 }

// kernel: custom-call.2
= control target key start
LH: loop header
LB: loop body
LE: loop exit
PB: predicated region body
PF: predicated region fallthrough
CT: control target
= control target key end

     0   :  { %s105_s0 = inlined_call_operand.vmem [shape: f32[2,4,1,1], index: 0, kind: input, shape index: {}]   ;;  %s106_s1 = inlined_call_operand.vmem [shape: f32[2,4,1,1], index: 1, kind: input, shape index: {}]   ;;  %s107_s2 = inlined_call_operand.hbm [shape: c64[2,4,1,1], index: 2, kind: output, shape index: {}]  }
   0x1   :  { %s3_s11 = scalar_lea.hbm %s107_s2, 2 }
   0x2   :  { %4 = vsyncpa [#allocation0], 0  ;;  %s6_s14 = sshll.u32 %s105_s0, 4  ;;  %s8_s17 = sshll.u32 %s107_s2, 4  ;;  %s7_s14 = int_to_ptr.vmem [resolvable:$true] %s6_s14  ;;  %s9_s17 = int_to_ptr.hbm [resolvable:$true] %s8_s17 }
   0x3   :  { %11 = dma.vmem_to_hbm [thread:$0]  %s7_s14, 32, %s9_s17, [#allocation0] }
   0x4   :  { %74 = dma.done.wait [#allocation0], 32  }
   0x5   :  { %75 = vsyncadd [#allocation0], 4294967264 }
   0x6   :  { %14 = vsyncpa [#allocation0], 1 }
   0x7   :  { %15 = vsyncpa [#allocation1], 0  ;;  %s17_s20 = sshll.u32 %s106_s1, 4  ;;  %s19_s21 = sshll.u32 %s3_s11, 4  ;;  %s18_s20 = int_to_ptr.vmem [resolvable:$true] %s17_s20  ;;  %s20_s21 = int_to_ptr.hbm [resolvable:$true] %s19_s21 }
   0x8   :  { %22 = dma.vmem_to_hbm [thread:$0]  %s18_s20, 32, %s20_s21, [#allocation1] }
   0x9   :  { %76 = dma.done.wait [#allocation1], 32  }
   0xa   :  { %77 = vsyncadd [#allocation1], 4294967264 }
   0xb   :  { %25 = vsyncpa [#allocation1], 1 }

// kernel: pseudo_complex_avg_pool2d.1
= control target key start
LH: loop header
LB: loop body
LE: loop exit
PB: predicated region body
PF: predicated region fallthrough
CT: control target
= control target key end

     0   :  { %vm23_vm0 = vcmask 7168   ;;  %vm25_vm1 = vcmask 15360   ;;  %s61_s0 = inlined_call_operand.vmem [shape: f32[8,256], index: 0, kind: input, shape index: {}]   ;;  %s62_s1 = inlined_call_operand.vmem [shape: f32[8,256], index: 1, kind: input, shape index: {}]   ;;  %s63_s2 = inlined_call_operand.vmem [shape: f32[8,2], index: 2, kind: output, shape index: {}]  }
   0x1   :  { %v11_v0 = vld [vmem:[%s61_s0] sm:$0xff]  ;;  %v12_v1 = vld [vmem:[%s61_s0 + $0x8] sm:$0xff] }
   0x2   :  { %v13_v2 = vadd.f32 %v12_v1, %v11_v0  ;;  %v17_v3 = vld [vmem:[%s62_s1] sm:$0xff]  ;;  %v18_v4 = vld [vmem:[%s62_s1 + $0x8] sm:$0xff] }
   0x3   :  { %v19_v5 = vadd.f32 %v18_v4, %v17_v3 }
   0x4   :  { %14 = vadd.xlane.f32.xlu0 %v13_v2 }
   0xc   :  { %20 = vadd.xlane.f32.xlu0 %v19_v5 }
  0x77   :  { %v15_v6 = vpop.xlane.xlu0 %14 }
  0x78   :  { %v16_v8 = vmul.f32 0.00390625, %v15_v6 }
  0x7f   :  { %v21_v7 = vpop.xlane.xlu0 %20 }
  0x80   :  { %v22_v9 = vmul.f32 0.00390625, %v21_v7 }
  0x82   :  { %v24_v10 = vsel %vm23_vm0, %v16_v8, %v22_v9 }
  0x83   :  { %26 = vst.msk [vmem:[%s63_s2] sm:$0xff] %vm25_vm1, %v24_v10 }

</bundles_post_ra>
